<compile_context>
chip_gen: v7x
topology: tpu7x:2x2x1
jax: 0.10.0
libtpu: 0.0.40
codegen_flags: <defaults>
</compile_context>

<pallas_src>
import functools

import jax
import jax.numpy as jnp
from jax.experimental import pallas as pl
from jax.experimental.pallas import tpu as pltpu


def _round_up(n: int, m: int) -> int:
    return ((n + m - 1) // m) * m


def ldmk_branch_kernel(x_ref, w1_ref, w2_ref, o_ref):
    # x_ref:  (TM, 512)   VMEM, f32  -> cast to bf16 in-kernel (halves x HBM traffic
    #                                   vs. a separate wrapper cast pass)
    # w1_ref: (512, 256)  VMEM, bf16 (resident across grid steps)
    # w2_ref: (256, 128)  VMEM, bf16 (lane-padded to 128, resident)
    # o_ref:  (TM, 128)   VMEM, bf16 (lane-dense store, half the writeback bytes)
    xb = x_ref[...].astype(jnp.bfloat16)
    h = jnp.dot(xb, w1_ref[...], preferred_element_type=jnp.float32)
    h = jnp.maximum(h, 0.0).astype(jnp.bfloat16)   # ReLU in f32 (v5e VPU has no bf16 path)
    out = jnp.dot(h, w2_ref[...], preferred_element_type=jnp.float32)
    o_ref[...] = out.astype(o_ref.dtype)


def prepare_ldmk_weights(w1, w2):
    """One-time weight prep (hoisted out of the hot path): bf16 cast + lane-pad w2 to 128."""
    c = w2.shape[1]
    c_pad = max(128, _round_up(c, 128))
    w2p = jnp.pad(w2, ((0, 0), (0, c_pad - c))) if c_pad != c else w2
    return w1.astype(jnp.bfloat16), w2p.astype(jnp.bfloat16)


@functools.partial(jax.jit, static_argnames=("num_classes", "tm"))
def ldmk_branch(x, w1c, w2c, *, num_classes: int, tm: int = 1024):
    """x: [B, 512] f32, w1c: [512, 256] bf16, w2c: [256, C_pad] bf16 -> [B, num_classes]."""
    B, D_in = x.shape
    D_hid = w1c.shape[1]
    C_pad = w2c.shape[1]
    assert w1c.shape == (D_in, D_hid)
    assert w2c.shape[0] == D_hid and C_pad % 128 == 0 and num_classes <= C_pad

    out_dtype = x.dtype

    # Padding-aware batch tiling: bound padding to <16 rows per tile; give the grid
    # >=2 steps for moderately-sized B so v7x shards the batch across both TensorCores.
    steps = pl.cdiv(B, tm)
    if steps == 1 and B >= 128:
        steps = 2
    tm_eff = _round_up(pl.cdiv(B, steps), 16)      # 16: bf16 sublane packing
    B_pad = steps * tm_eff
    xp = jnp.pad(x, ((0, B_pad - B), (0, 0))) if B_pad != B else x

    cost = pl.CostEstimate(
        flops=2 * B_pad * (D_in * D_hid + D_hid * C_pad),
        transcendentals=0,
        bytes_accessed=(xp.size * xp.dtype.itemsize
                        + w1c.size * w1c.dtype.itemsize
                        + w2c.size * w2c.dtype.itemsize
                        + B_pad * C_pad * 2),
    )

    out = pl.pallas_call(
        ldmk_branch_kernel,
        out_shape=jax.ShapeDtypeStruct((B_pad, C_pad), jnp.bfloat16),
        grid_spec=pltpu.PrefetchScalarGridSpec(
            num_scalar_prefetch=0,
            grid=(steps,),
            in_specs=[
                pl.BlockSpec((tm_eff, D_in), lambda i: (i, 0)),   # x tiles stream
                pl.BlockSpec((D_in, D_hid), lambda i: (0, 0)),    # w1 resident
                pl.BlockSpec((D_hid, C_pad), lambda i: (0, 0)),   # w2 resident (padded)
            ],
            out_specs=pl.BlockSpec((tm_eff, C_pad), lambda i: (i, 0)),
        ),
        compiler_params=pltpu.CompilerParams(
            dimension_semantics=("parallel",)),
        cost_estimate=cost,
    )(xp, w1c, w2c)

    # Padded batch rows are zero-filled (zeros survive ReLU) and sliced off here,
    # as are the padded output lanes beyond num_classes.
    return out[:B, :num_classes].astype(out_dtype)


def reference(x, w1, w2):
    h = jnp.maximum(x @ w1, 0.0)
    return h @ w2


if __name__ == "__main__":
    num_classes = 10
    B = 8

    key = jax.random.PRNGKey(0)
    kx, k1, k2 = jax.random.split(key, 3)

    # Deterministic synthetic parameters (nn.Linear(512,256), nn.Linear(256,10)),
    # stored as [in, out] (PyTorch weight transposed).
    x = jax.random.normal(kx, (B, 512), dtype=jnp.float32)
    w1 = jax.random.normal(k1, (512, 256), dtype=jnp.float32) * (1.0 / 512 ** 0.5)
    w2 = jax.random.normal(k2, (256, num_classes), dtype=jnp.float32) * (1.0 / 256 ** 0.5)

    # One-time weight preparation (hoisted out of the per-call hot path).
    w1c, w2c = prepare_ldmk_weights(w1, w2)

    out = ldmk_branch(x, w1c, w2c, num_classes=num_classes)
    jax.block_until_ready(out)

    ref = reference(x, w1, w2)
    assert out.shape == (B, num_classes)
    # bf16 MXU inputs + bf16 output store -> loosened tolerance vs f32 reference.
    assert jnp.allclose(out, ref, atol=6e-2, rtol=6e-2), \
        f"max abs err {jnp.max(jnp.abs(out - ref))}"

    print("KERNEL_OK")
</pallas_src>

<mosaic_0001>
module attributes {stable_mosaic.version = 11 : i64} {
  func.func @ldmk_branch_kernel(%arg0: i32, %arg1: memref<16x512xf32, #tpu.memory_space<vmem>>, %arg2: memref<512x256xbf16, #tpu.memory_space<vmem>>, %arg3: memref<256x128xbf16, #tpu.memory_space<vmem>>, %arg4: memref<16x128xbf16, #tpu.memory_space<vmem>>) attributes {dimension_semantics = [#tpu.dimension_semantics<parallel>], iteration_bounds = array<i64: 1>, scalar_prefetch = 0 : i64, scratch_operands = 0 : i64, tpu.core_type = #tpu.core_type<tc>, window_params = [{transform_indices = @transform_0, window_bounds = array<i64: 16, 512>}, {pipeline_mode = #tpu.pipeline_mode<synchronous>, transform_indices = @transform_1, window_bounds = array<i64: 512, 256>}, {pipeline_mode = #tpu.pipeline_mode<synchronous>, transform_indices = @transform_2, window_bounds = array<i64: 256, 128>}, {transform_indices = @transform_3, window_bounds = array<i64: 16, 128>}]} {
    %c0 = arith.constant 0 : index
    %c0_0 = arith.constant 0 : index
    %0 = vector.load %arg1[%c0, %c0_0] : memref<16x512xf32, #tpu.memory_space<vmem>>, vector<16x512xf32>
    %1 = arith.truncf %0 : vector<16x512xf32> to vector<16x512xbf16>
    %c0_1 = arith.constant 0 : index
    %c0_2 = arith.constant 0 : index
    %2 = vector.load %arg2[%c0_1, %c0_2] : memref<512x256xbf16, #tpu.memory_space<vmem>>, vector<512x256xbf16>
    %cst = arith.constant dense<0.000000e+00> : vector<16x256xf32>
    %3 = tpu.matmul %1, %2, %cst {dimension_numbers = #tpu.dot_dimension_numbers<[1], [0], [0], [1], [0, 0, 1, 1], [], []>} : vector<16x512xbf16>, vector<512x256xbf16>, vector<16x256xf32> -> vector<16x256xf32>
    %cst_3 = arith.constant 0.000000e+00 : f32
    %4 = vector.broadcast %cst_3 : f32 to vector<16x256xf32>
    %5 = arith.maximumf %3, %4 : vector<16x256xf32>
    %6 = arith.truncf %5 : vector<16x256xf32> to vector<16x256xbf16>
    %c0_4 = arith.constant 0 : index
    %c0_5 = arith.constant 0 : index
    %7 = vector.load %arg3[%c0_4, %c0_5] : memref<256x128xbf16, #tpu.memory_space<vmem>>, vector<256x128xbf16>
    %cst_6 = arith.constant dense<0.000000e+00> : vector<16x128xf32>
    %8 = tpu.matmul %6, %7, %cst_6 {dimension_numbers = #tpu.dot_dimension_numbers<[1], [0], [0], [1], [0, 0, 1, 1], [], []>} : vector<16x256xbf16>, vector<256x128xbf16>, vector<16x128xf32> -> vector<16x128xf32>
    %9 = arith.truncf %8 : vector<16x128xf32> to vector<16x128xbf16>
    %c0_7 = arith.constant 0 : index
    %c0_8 = arith.constant 0 : index
    %10 = vector.load %arg4[%c0_7, %c0_8] : memref<16x128xbf16, #tpu.memory_space<vmem>>, vector<16x128xbf16>
    tpu.vector_store %arg4[%c0_7, %c0_8], %9 {strides = array<i32>} : memref<16x128xbf16, #tpu.memory_space<vmem>>, vector<16x128xbf16>,
    return
  }
  func.func @transform_0(%arg0: i32) -> (i32, i32) {
    %c0_i32 = arith.constant 0 : i32
    %c0_i32_0 = arith.constant 0 : i32
    return %arg0, %c0_i32 : i32, i32
  }
  func.func @transform_1(%arg0: i32) -> (i32, i32) {
    %c0_i32 = arith.constant 0 : i32
    %c0_i32_0 = arith.constant 0 : i32
    %c0_i32_1 = arith.constant 0 : i32
    return %c0_i32, %c0_i32_0 : i32, i32
  }
  func.func @transform_2(%arg0: i32) -> (i32, i32) {
    %c0_i32 = arith.constant 0 : i32
    %c0_i32_0 = arith.constant 0 : i32
    %c0_i32_1 = arith.constant 0 : i32
    return %c0_i32, %c0_i32_0 : i32, i32
  }
  func.func @transform_3(%arg0: i32) -> (i32, i32) {
    %c0_i32 = arith.constant 0 : i32
    %c0_i32_0 = arith.constant 0 : i32
    return %arg0, %c0_i32 : i32, i32
  }
}

</mosaic_0001>

<bundles_post_ra>
// kernel: ldmk_branch.1
= control target key start
LH: loop header
LB: loop body
LE: loop exit
PB: predicated region body
PF: predicated region fallthrough
CT: control target
= control target key end

     0   :  { %8 = vsyncpa [#allocation3], 0  ;;  %s1074_s0 = inlined_call_operand.vmem [shape: f32[16,512], index: 0, kind: input, shape index: {}]   ;;  %s1075_s1 = inlined_call_operand.hbm [shape: bf16[512,256], index: 1, kind: input, shape index: {}]   ;;  %s1076_s2 = inlined_call_operand.hbm [shape: bf16[256,128], index: 2, kind: input, shape index: {}]   ;;  %s1077_s3 = inlined_call_operand.vmem [shape: bf16[16,128], index: 3, kind: output, shape index: {}]  }
   0x1   :  { %9 = vsyncpa [#allocation5], 0  ;;  %s997_s12 = smov [#allocation2]   ;;  %s949_s16 = scalar_lea.hbm %s1075_s1, 8192 }
   0x2   :  { %s17_s13 = sshll.u32 %s997_s12, 4  ;;  %p950_p0 = scmp.ne.s32.totalorder %s1075_s1, %s949_s16  ;;  %s18_s13 = int_to_ptr.vmem [resolvable:$true] %s17_s13 }
   0x3   :  { %p953_p1 = scmp.lt.u32.totalorder %s949_s16, %s1075_s1 }
   0x5   :  { %p955_p2 = pnand %p953_p1, %p950_p0 }
   0x7   :  { %958 = shalt.err (!%p955_p2)
}
   0x8   :  { %s959_s21 = scalar_lea.vmem %s18_s13, 8192  ;;  %p964_p4 = scmp.lt.s32.totalorder %s18_s13, %s18_s13 }
   0x9   :  { %p960_p3 = scmp.ne.s32.totalorder %s18_s13, %s959_s21  ;;  %p965_p5 = scmp.lt.s32.totalorder %s959_s21, %s959_s21 }
   0xb   :  { %p966_p6 = por %p965_p5, %p964_p4 }
   0xd   :  { %p967_p7 = pnand %p966_p6, %p960_p3 }
   0xf   :  { %970 = shalt.err (!%p967_p7)
}
  0x10   :  { %s998_s22 = smov 128   ;;  %s999_s23 = smov 8  }
  0x11   :  { %23 = dma.hbm_to_vmem [thread:$0]  %s1075_s1, 8192, %s18_s13, [#allocation3], %s998_s22, %s998_s22, %s999_s23  }
  0x12   :  { %s1000_s26 = smov [#allocation4]   ;;  %s971_s30 = scalar_lea.hbm %s1076_s2, 2048 }
  0x13   :  { %s29_s27 = sshll.u32 %s1000_s26, 4  ;;  %p972_p8 = scmp.ne.s32.totalorder %s1076_s2, %s971_s30  ;;  %s30_s27 = int_to_ptr.vmem [resolvable:$true] %s29_s27 }
  0x14   :  { %p975_p9 = scmp.lt.u32.totalorder %s971_s30, %s1076_s2 }
  0x16   :  { %p977_p10 = pnand %p975_p9, %p972_p8 }
  0x18   :  { %980 = shalt.err (!%p977_p10)
}
  0x19   :  { %s981_s8 = scalar_lea.vmem %s30_s27, 2048  ;;  %p986_p12 = scmp.lt.s32.totalorder %s30_s27, %s30_s27 }
  0x1a   :  { %p982_p11 = scmp.ne.s32.totalorder %s30_s27, %s981_s8  ;;  %p987_p13 = scmp.lt.s32.totalorder %s981_s8, %s981_s8 }
  0x1c   :  { %p988_p0 = por %p987_p13, %p986_p12 }
  0x1e   :  { %p989_p1 = pnand %p988_p0, %p982_p11 }
  0x20   :  { %992 = shalt.err (!%p989_p1)
}
  0x21   :  { %s1001_s1 = smov 64   ;;  %s1002_s9 = smov 4  }
  0x22   :  { %35 = dma.hbm_to_vmem [thread:$0]  %s1076_s2, 2048, %s30_s27, [#allocation5], %s1001_s1, %s1001_s1, %s1002_s9  }
  0x23   :  { %993 = dma.done.wait [#allocation3], 8192  }
  0x24   :  { %994 = vsyncadd [#allocation3], 4294959104 }
  0x25   :  { %995 = dma.done.wait [#allocation5], 2048  }
  0x26   :  { %996 = vsyncadd [#allocation5], 4294965248  ;;  %v837_v0 = vld [vmem:[#allocation2 + $0x4] ss:$8 sps:$4 sm:$0xff]   ;;  %v841_v2 = vld [vmem:[#allocation2] ss:$8 sps:$4 sm:$0xff]  }
  0x27   :  { %v839_v1 = vld [vmem:[#allocation2 + $0x104] ss:$8 sps:$4 sm:$0xff]   ;;  %439 = vmatprep.subr.bf16.mxu1 %v837_v0  ;;  %v842_v3 = vld [vmem:[#allocation2 + $0x100] ss:$8 sps:$4 sm:$0xff]   ;;  %v843_v4 = vld [vmem:[#allocation2 + $0x14] ss:$8 sps:$4 sm:$0xff]  }
  0x28   :  { %482 = vmatprep.subr.bf16.mxu0 %v839_v1  ;;  %440 = vmatpush1.bf16.msra.mxu1 %v841_v2  ;;  %v845_v5 = vld [vmem:[#allocation2 + $0x114] ss:$8 sps:$4 sm:$0xff]   ;;  %v847_v6 = vld [vmem:[#allocation2 + $0x10] ss:$8 sps:$4 sm:$0xff]   ;;  %v849_v8 = vld [vmem:[#allocation2 + $0x24] ss:$8 sps:$4 sm:$0xff]  }
  0x29   :  { %483 = vmatpush1.bf16.msra.mxu0 %v842_v3  ;;  %441 = vmatprep.subr.bf16.mxu1 %v843_v4  ;;  %v848_v7 = vld [vmem:[#allocation2 + $0x110] ss:$8 sps:$4 sm:$0xff]   ;;  %v851_v9 = vld [vmem:[#allocation2 + $0x124] ss:$8 sps:$4 sm:$0xff]   ;;  %v853_v10 = vld [vmem:[#allocation2 + $0x20] ss:$8 sps:$4 sm:$0xff]  }
  0x2a   :  { %484 = vmatprep.subr.bf16.mxu0 %v845_v5  ;;  %v854_v11 = vld [vmem:[#allocation2 + $0x120] ss:$8 sps:$4 sm:$0xff]   ;;  %v855_v12 = vld [vmem:[#allocation2 + $0x34] ss:$8 sps:$4 sm:$0xff]   ;;  %v859_v14 = vld [vmem:[#allocation2 + $0x30] ss:$8 sps:$4 sm:$0xff]  }
  0x2b   :  { %v857_v13 = vld [vmem:[#allocation2 + $0x134] ss:$8 sps:$4 sm:$0xff]   ;;  %v860_v15 = vld [vmem:[#allocation2 + $0x130] ss:$8 sps:$4 sm:$0xff]   ;;  %v861_v16 = vld [vmem:[#allocation2 + $0x44] ss:$8 sps:$4 sm:$0xff]  }
  0x2c   :  { %442 = vmatpush1.bf16.msra.mxu1 %v847_v6  ;;  %v863_v17 = vld [vmem:[#allocation2 + $0x144] ss:$8 sps:$4 sm:$0xff]   ;;  %v865_v18 = vld [vmem:[#allocation2 + $0x40] ss:$8 sps:$4 sm:$0xff]   ;;  %v867_v20 = vld [vmem:[#allocation2 + $0x54] ss:$8 sps:$4 sm:$0xff]  }
  0x2d   :  { %485 = vmatpush1.bf16.msra.mxu0 %v848_v7  ;;  %443 = vmatprep.subr.bf16.mxu1 %v849_v8  ;;  %v866_v19 = vld [vmem:[#allocation2 + $0x140] ss:$8 sps:$4 sm:$0xff]   ;;  %v869_v21 = vld [vmem:[#allocation2 + $0x154] ss:$8 sps:$4 sm:$0xff]   ;;  %v871_v22 = vld [vmem:[#allocation2 + $0x50] ss:$8 sps:$4 sm:$0xff]  }
  0x2e   :  { %486 = vmatprep.subr.bf16.mxu0 %v851_v9  ;;  %v872_v23 = vld [vmem:[#allocation2 + $0x150] ss:$8 sps:$4 sm:$0xff]   ;;  %v873_v24 = vld [vmem:[#allocation2 + $0x64] ss:$8 sps:$4 sm:$0xff]   ;;  %v877_v26 = vld [vmem:[#allocation2 + $0x60] ss:$8 sps:$4 sm:$0xff]  }
  0x2f   :  { %v875_v25 = vld [vmem:[#allocation2 + $0x164] ss:$8 sps:$4 sm:$0xff]   ;;  %v878_v27 = vld [vmem:[#allocation2 + $0x160] ss:$8 sps:$4 sm:$0xff]   ;;  %v879_v28 = vld [vmem:[#allocation2 + $0x74] ss:$8 sps:$4 sm:$0xff]  }
  0x30   :  { %444 = vmatpush1.bf16.msra.mxu1 %v853_v10  ;;  %v881_v29 = vld [vmem:[#allocation2 + $0x174] ss:$8 sps:$4 sm:$0xff]   ;;  %v883_v30 = vld [vmem:[#allocation2 + $0x70] ss:$8 sps:$4 sm:$0xff]   ;;  %v885_v32 = vld [vmem:[#allocation2 + $0x84] ss:$8 sps:$4 sm:$0xff]  }
  0x31   :  { %487 = vmatpush1.bf16.msra.mxu0 %v854_v11  ;;  %445 = vmatprep.subr.bf16.mxu1 %v855_v12  ;;  %v884_v31 = vld [vmem:[#allocation2 + $0x170] ss:$8 sps:$4 sm:$0xff]   ;;  %v887_v33 = vld [vmem:[#allocation2 + $0x184] ss:$8 sps:$4 sm:$0xff]   ;;  %v889_v34 = vld [vmem:[#allocation2 + $0x80] ss:$8 sps:$4 sm:$0xff]  }
  0x32   :  { %488 = vmatprep.subr.bf16.mxu0 %v857_v13  ;;  %v890_v35 = vld [vmem:[#allocation2 + $0x180] ss:$8 sps:$4 sm:$0xff]   ;;  %v891_v36 = vld [vmem:[#allocation2 + $0x94] ss:$8 sps:$4 sm:$0xff]   ;;  %v895_v38 = vld [vmem:[#allocation2 + $0x90] ss:$8 sps:$4 sm:$0xff]  }
  0x33   :  { %v893_v37 = vld [vmem:[#allocation2 + $0x194] ss:$8 sps:$4 sm:$0xff]   ;;  %v896_v39 = vld [vmem:[#allocation2 + $0x190] ss:$8 sps:$4 sm:$0xff]   ;;  %v897_v40 = vld [vmem:[#allocation2 + $0xa4] ss:$8 sps:$4 sm:$0xff]  }
  0x34   :  { %446 = vmatpush1.bf16.msra.mxu1 %v859_v14  ;;  %v899_v41 = vld [vmem:[#allocation2 + $0x1a4] ss:$8 sps:$4 sm:$0xff]   ;;  %v901_v42 = vld [vmem:[#allocation2 + $0xa0] ss:$8 sps:$4 sm:$0xff]   ;;  %v903_v44 = vld [vmem:[#allocation2 + $0xb4] ss:$8 sps:$4 sm:$0xff]  }
  0x35   :  { %489 = vmatpush1.bf16.msra.mxu0 %v860_v15  ;;  %447 = vmatprep.subr.bf16.mxu1 %v861_v16  ;;  %v902_v43 = vld [vmem:[#allocation2 + $0x1a0] ss:$8 sps:$4 sm:$0xff]   ;;  %v905_v45 = vld [vmem:[#allocation2 + $0x1b4] ss:$8 sps:$4 sm:$0xff]   ;;  %v907_v50 = vld [vmem:[#allocation2 + $0xb0] ss:$8 sps:$4 sm:$0xff]  }
  0x36   :  { %490 = vmatprep.subr.bf16.mxu0 %v863_v17  ;;  %v44_v46 = vld [vmem:[%s1074_s0 + $0x8] sm:$0xff]  ;;  %v46_v48 = vld [vmem:[%s1074_s0 + $0x18] sm:$0xff]  ;;  %v43_v6 = vld [vmem:[%s1074_s0] sm:$0xff] }
  0x37   :  { %v48_v47 = vld [vmem:[%s1074_s0 + $0x28] sm:$0xff]  ;;  %v50_v49 = vld [vmem:[%s1074_s0 + $0x38] sm:$0xff]  ;;  %v47_v7 = vld [vmem:[%s1074_s0 + $0x20] sm:$0xff] }
  0x38   :  { %448 = vmatpush1.bf16.msra.mxu1 %v865_v18  ;;  %v908_v51 = vld [vmem:[#allocation2 + $0x1b0] ss:$8 sps:$4 sm:$0xff]   ;;  %v909_v52 = vld [vmem:[#allocation2 + $0xc4] ss:$8 sps:$4 sm:$0xff]   ;;  %v52_v53 = vpack.c.bf16 %v48_v47, %v44_v46  ;;  %v54_v54 = vpack.c.bf16 %v50_v49, %v46_v48  ;;  %v913_v56 = vld [vmem:[#allocation2 + $0xc0] ss:$8 sps:$4 sm:$0xff]   ;;  %v51_v11 = vpack.c.bf16 %v47_v7, %v43_v6 }
  0x39   :  { %491 = vmatpush1.bf16.msra.mxu0 %v866_v19  ;;  %449 = vmatprep.subr.bf16.mxu1 %v867_v20  ;;  %v911_v55 = vld [vmem:[#allocation2 + $0x1c4] ss:$8 sps:$4 sm:$0xff]   ;;  %v914_v57 = vld [vmem:[#allocation2 + $0x1c0] ss:$8 sps:$4 sm:$0xff]   ;;  %v915_v58 = vld [vmem:[#allocation2 + $0xd4] ss:$8 sps:$4 sm:$0xff]  }
  0x3a   :  { %492 = vmatprep.subr.bf16.mxu0 %v869_v21  ;;  %471 = vmatprep.mubr.bf16.mxu1 %v52_v53  ;;  %v917_v59 = vld [vmem:[#allocation2 + $0x1d4] ss:$8 sps:$4 sm:$0xff]   ;;  %v919_v60 = vld [vmem:[#allocation2 + $0xd0] ss:$8 sps:$4 sm:$0xff]   ;;  %v921_v62 = vld [vmem:[#allocation2 + $0xe4] ss:$8 sps:$4 sm:$0xff]  }
  0x3b   :  { %514 = vmatprep.mubr.bf16.mxu0 %v54_v54  ;;  %v920_v61 = vld [vmem:[#allocation2 + $0x1d0] ss:$8 sps:$4 sm:$0xff]   ;;  %v923_v63 = vld [vmem:[#allocation2 + $0x1e4] ss:$8 sps:$4 sm:$0xff]   ;;  %v925_v0 = vld [vmem:[#allocation2 + $0xe0] ss:$8 sps:$4 sm:$0xff]  }
  0x3c   :  { %450 = vmatpush1.bf16.msra.mxu1 %v871_v22  ;;  %v926_v1 = vld [vmem:[#allocation2 + $0x1e0] ss:$8 sps:$4 sm:$0xff]   ;;  %v927_v2 = vld [vmem:[#allocation2 + $0xf4] ss:$8 sps:$4 sm:$0xff]   ;;  %v931_v4 = vld [vmem:[#allocation2 + $0xf0] ss:$8 sps:$4 sm:$0xff]  }
  0x3d   :  { %493 = vmatpush1.bf16.msra.mxu0 %v872_v23  ;;  %451 = vmatprep.subr.bf16.mxu1 %v873_v24  ;;  %v929_v3 = vld [vmem:[#allocation2 + $0x1f4] ss:$8 sps:$4 sm:$0xff]   ;;  %v932_v5 = vld [vmem:[#allocation2 + $0x1f0] ss:$8 sps:$4 sm:$0xff]   ;;  %v933_v10 = vld [vmem:[#allocation4 + $0x40] sm:$0xff]  }
  0x3e   :  { %494 = vmatprep.subr.bf16.mxu0 %v875_v25  ;;  %v45_v8 = vld [vmem:[%s1074_s0 + $0x10] sm:$0xff]  ;;  %v934_v13 = vld [vmem:[#allocation4] sm:$0xff]   ;;  %v935_v14 = vld [vmem:[#allocation4 + $0x48] sm:$0xff]  }
  0x3f   :  { %v49_v9 = vld [vmem:[%s1074_s0 + $0x30] sm:$0xff]  ;;  %v936_v15 = vld [vmem:[#allocation4 + $0x8] sm:$0xff]   ;;  %v939_v18 = vld [vmem:[#allocation4 + $0x58] sm:$0xff]  }
  0x40   :  { %452 = vmatpush1.bf16.msra.mxu1 %v877_v26  ;;  %v53_v12 = vpack.c.bf16 %v49_v9, %v45_v8  ;;  %v937_v16 = vld [vmem:[#allocation4 + $0x50] sm:$0xff]   ;;  %v940_v19 = vld [vmem:[#allocation4 + $0x18] sm:$0xff]   ;;  %v941_v20 = vld [vmem:[#allocation4 + $0x60] sm:$0xff]  }
  0x41   :  { %495 = vmatpush1.bf16.msra.mxu0 %v878_v27  ;;  %453 = vmatprep.subr.bf16.mxu1 %v879_v28  ;;  %v938_v17 = vld [vmem:[#allocation4 + $0x10] sm:$0xff]   ;;  %v942_v21 = vld [vmem:[#allocation4 + $0x20] sm:$0xff]   ;;  %v943_v22 = vld [vmem:[#allocation4 + $0x68] sm:$0xff]  }
  0x42   :  { %496 = vmatprep.subr.bf16.mxu0 %v881_v29  ;;  %v944_v23 = vld [vmem:[#allocation4 + $0x28] sm:$0xff]   ;;  %v945_v24 = vld [vmem:[#allocation4 + $0x70] sm:$0xff]   ;;  %v947_v26 = vld [vmem:[#allocation4 + $0x78] sm:$0xff]  }
  0x43   :  { %v946_v25 = vld [vmem:[#allocation4 + $0x30] sm:$0xff]   ;;  %v948_v27 = vld [vmem:[#allocation4 + $0x38] sm:$0xff]  }
  0x44   :  { %454 = vmatpush1.bf16.msra.mxu1 %v883_v30 }
  0x45   :  { %497 = vmatpush1.bf16.msra.mxu0 %v884_v31  ;;  %455 = vmatprep.subr.bf16.mxu1 %v885_v32 }
  0x46   :  { %498 = vmatprep.subr.bf16.mxu0 %v887_v33 }
  0x48   :  { %456 = vmatpush1.bf16.msra.mxu1 %v889_v34 }
  0x49   :  { %499 = vmatpush1.bf16.msra.mxu0 %v890_v35  ;;  %457 = vmatprep.subr.bf16.mxu1 %v891_v36 }
  0x4a   :  { %500 = vmatprep.subr.bf16.mxu0 %v893_v37 }
  0x4c   :  { %458 = vmatpush1.bf16.msra.mxu1 %v895_v38 }
  0x4d   :  { %501 = vmatpush1.bf16.msra.mxu0 %v896_v39  ;;  %459 = vmatprep.subr.bf16.mxu1 %v897_v40 }
  0x4e   :  { %502 = vmatprep.subr.bf16.mxu0 %v899_v41 }
  0x50   :  { %460 = vmatpush1.bf16.msra.mxu1 %v901_v42 }
  0x51   :  { %503 = vmatpush1.bf16.msra.mxu0 %v902_v43  ;;  %461 = vmatprep.subr.bf16.mxu1 %v903_v44 }
  0x52   :  { %504 = vmatprep.subr.bf16.mxu0 %v905_v45 }
  0x54   :  { %462 = vmatpush1.bf16.msra.mxu1 %v907_v50 }
  0x55   :  { %505 = vmatpush1.bf16.msra.mxu0 %v908_v51  ;;  %463 = vmatprep.subr.bf16.mxu1 %v909_v52 }
  0x56   :  { %506 = vmatprep.subr.bf16.mxu0 %v911_v55 }
  0x58   :  { %464 = vmatpush1.bf16.msra.mxu1 %v913_v56 }
  0x59   :  { %507 = vmatpush1.bf16.msra.mxu0 %v914_v57  ;;  %465 = vmatprep.subr.bf16.mxu1 %v915_v58 }
  0x5a   :  { %508 = vmatprep.subr.bf16.mxu0 %v917_v59 }
  0x5c   :  { %466 = vmatpush1.bf16.msra.mxu1 %v919_v60 }
  0x5d   :  { %509 = vmatpush1.bf16.msra.mxu0 %v920_v61  ;;  %467 = vmatprep.subr.bf16.mxu1 %v921_v62 }
  0x5e   :  { %510 = vmatprep.subr.bf16.mxu0 %v923_v63 }
  0x60   :  { %468 = vmatpush1.bf16.msra.mxu1 %v925_v0 }
  0x61   :  { %511 = vmatpush1.bf16.msra.mxu0 %v926_v1  ;;  %469 = vmatprep.subr.bf16.mxu1 %v927_v2 }
  0x62   :  { %512 = vmatprep.subr.bf16.mxu0 %v929_v3 }
  0x64   :  { %470 = vmatpush1.bf16.msra.mxu1 %v931_v4 }
  0x65   :  { %513 = vmatpush1.bf16.msra.mxu0 %v932_v5  ;;  %805 = vmatprep.subr.bf16.mxu1 %v933_v10 }
  0x67   :  { %472 = vmatmul.mubr.bf16.vlgmr.msra.gmra.mrb[0].mxu1 %v51_v11 }
  0x68   :  { %515 = vmatmul.mubr.bf16.vlgmr.msra.gmra.mrb[0].mxu0 %v53_v12  ;;  %806 = vmatpush3.bf16.msra.mxu1 %v934_v13 }
  0x69   :  { %807 = vmatprep.subr.bf16.mxu1 %v935_v14 }
  0x6c   :  { %808 = vmatpush3.bf16.msra.mxu1 %v936_v15 }
  0x6d   :  { %809 = vmatprep.subr.bf16.mxu1 %v937_v16 }
  0x70   :  { %810 = vmatpush3.bf16.msra.mxu1 %v938_v17 }
  0x71   :  { %811 = vmatprep.subr.bf16.mxu1 %v939_v18 }
  0x74   :  { %812 = vmatpush3.bf16.msra.mxu1 %v940_v19 }
  0x75   :  { %813 = vmatprep.subr.bf16.mxu1 %v941_v20 }
  0x78   :  { %814 = vmatpush3.bf16.msra.mxu1 %v942_v21 }
  0x79   :  { %815 = vmatprep.subr.bf16.mxu1 %v943_v22 }
  0x7c   :  { %816 = vmatpush3.bf16.msra.mxu1 %v944_v23 }
  0x7d   :  { %817 = vmatprep.subr.bf16.mxu1 %v945_v24 }
  0x80   :  { %818 = vmatpush3.bf16.msra.mxu1 %v946_v25 }
  0x81   :  { %819 = vmatprep.subr.bf16.mxu1 %v947_v26 }
  0x84   :  { %820 = vmatpush3.bf16.msra.mxu1 %v948_v27 }
 0x13a   :  { %v473_v28 = vpop.f32.mrb[0].mxu1 }
 0x13b   :  { %v516_v29 = vpop.f32.mrb[0].mxu0  ;;  %v475_v31 = vpop.f32.mrb[1].mxu1 }
 0x13c   :  { %v517_v30 = vadd.f32 %v516_v29, %v473_v28  ;;  %v518_v32 = vpop.f32.mrb[1].mxu0  ;;  %v477_v34 = vpop.f32.mrb[2].mxu1 }
 0x13d   :  { %v519_v33 = vadd.f32 %v518_v32, %v475_v31  ;;  %v520_v35 = vpop.f32.mrb[2].mxu0  ;;  %v479_v37 = vpop.f32.mrb[3].mxu1 }
 0x13e   :  { %v521_v36 = vadd.f32 %v520_v35, %v477_v34  ;;  %v522_v38 = vpop.f32.mrb[3].mxu0  ;;  %v525_v40 = vmax.f32 %v517_v30, 0.0 }
 0x13f   :  { %v523_v39 = vadd.f32 %v522_v38, %v479_v37  ;;  %v526_v42 = vmax.f32 %v519_v33, 0.0 }
 0x140   :  { %v527_v41 = vmax.f32 %v521_v36, 0.0 }
 0x141   :  { %v528_v43 = vmax.f32 %v523_v39, 0.0 }
 0x142   :  { %v529_v44 = vpack.c.bf16 %v527_v41, %v525_v40 }
 0x143   :  { %v530_v45 = vpack.c.bf16 %v528_v43, %v526_v42 }
 0x145   :  { %691 = vmatprep.mubr.bf16.mxu1 %v530_v45 }
 0x146   :  { %692 = vmatmul.mubr.bf16.vlgmr.msra.gmra.mrb[4].mxu1 %v529_v44 }
 0x219   :  { %v821_v46 = vpop.f32.mrb[4].mxu1 }
 0x21a   :  { %v822_v47 = vpop.f32.mrb[5].mxu1 }
 0x21b   :  { %v823_v48 = vadd.f32 %v822_v47, %v821_v46  ;;  %v824_v49 = vpop.f32.mrb[6].mxu1 }
 0x21c   :  { %v825_v50 = vpop.f32.mrb[7].mxu1 }
 0x21d   :  { %v826_v51 = vadd.f32 %v825_v50, %v824_v49 }
 0x21f   :  { %v803_v52 = vpack.c.bf16 %v826_v51, %v823_v48 }
 0x221   :  { %804 = vst [vmem:[%s1077_s3] sm:$0xff] %v803_v52  }
 0x222   :  { %714 = vsyncpa [#allocation3], 1 }
 0x223   :  { %715 = vsyncpa [#allocation5], 1 }

</bundles_post_ra>
